<compile_context>
chip_gen: v7x
topology: tpu7x:2x2x1
jax: 0.10.0
libtpu: 0.0.40
codegen_flags: <defaults>
</compile_context>

<pallas_src>
import functools

import jax
import jax.numpy as jnp
from jax.experimental import pallas as pl
from jax.experimental.pallas import tpu as pltpu


def _round_up(x, m):
    return ((x + m - 1) // m) * m


def _policy_kernel(x_ref, inv_std_ref, shift_ref,
                   w1_ref, b1_ref, w2_ref, b2_ref, w3_ref, b3_ref,
                   out_ref, *, mxu_dtype):
    # Normalize + clamp on the VPU (divide replaced by precomputed reciprocal).
    x = x_ref[...]
    xn = jnp.clip(x * inv_std_ref[...] + shift_ref[...], -5.0, 5.0)

    # 3-layer MLP: MXU operands in mxu_dtype (bf16 on v6e/v7x), f32 accumulate,
    # bias-add / tanh kept in f32 (v5e VPU/EUP have no bf16 path).
    h1 = jnp.tanh(
        jnp.dot(xn.astype(mxu_dtype), w1_ref[...],
                preferred_element_type=jnp.float32) + b1_ref[...])
    h2 = jnp.tanh(
        jnp.dot(h1.astype(mxu_dtype), w2_ref[...],
                preferred_element_type=jnp.float32) + b2_ref[...])
    y = jnp.dot(h2.astype(mxu_dtype), w3_ref[...],
                preferred_element_type=jnp.float32) + b3_ref[...]

    out_ref[...] = jnp.tanh(y).astype(out_ref.dtype)


def state_independent_policy_forward(states, params, *, b_tile=1024,
                                     use_bf16_matmul=True):
    """states: (B, S) f32 -> actions (B, A) f32."""
    mean, std = params["mean"], params["std"]
    w1, b1 = params["w1"], params["b1"]
    w2, b2 = params["w2"], params["b2"]
    w3, b3 = params["w3"], params["b3"]

    B, S = states.shape
    H1 = w1.shape[1]
    H2 = w2.shape[1]
    A = w3.shape[1]

    # --- batch tiling -------------------------------------------------------
    # NOTE: for tiny batches (like the B=2 smoke test below) a plain XLA fused
    # path would be cheaper than any kernel launch; we still route through the
    # kernel here (with a shrunk tile) so the Pallas path is exercised.
    bt = min(b_tile, _round_up(B, 8))          # sublane-aligned tile
    B_pad = _round_up(B, bt)
    if B_pad != B:
        states = jnp.pad(states, ((0, B_pad - B), (0, 0)))

    # --- lane-dense output: pad action dim up to a multiple of 128 ----------
    A_pad = _round_up(max(A, 128), 128)
    if A_pad != A:
        w3 = jnp.pad(w3, ((0, 0), (0, A_pad - A)))
        b3 = jnp.pad(b3, ((0, 0), (0, A_pad - A)))

    # --- fold (x - mean)/std into a multiply-add (no per-element divide) ----
    inv_std = 1.0 / std
    shift = -mean * inv_std

    mxu_dtype = jnp.bfloat16 if use_bf16_matmul else jnp.float32
    w1c = w1.astype(mxu_dtype)
    w2c = w2.astype(mxu_dtype)
    w3c = w3.astype(mxu_dtype)

    def resident(shape):
        # Full-array block + constant index_map -> stays VMEM-resident
        # across every grid step (weights / biases / normalization rows).
        return pl.BlockSpec(shape, lambda i: tuple(0 for _ in shape))

    out = pl.pallas_call(
        functools.partial(_policy_kernel, mxu_dtype=mxu_dtype),
        out_shape=jax.ShapeDtypeStruct((B_pad, A_pad), jnp.float32),
        grid=(B_pad // bt,),
        in_specs=[
            pl.BlockSpec((bt, S), lambda i: (i, 0)),   # states: tiled over batch
            resident((1, S)),        # inv_std
            resident((1, S)),        # shift = -mean/std
            resident((S, H1)),       # w1
            resident((1, H1)),       # b1
            resident((H1, H2)),      # w2
            resident((1, H2)),       # b2
            resident((H2, A_pad)),   # w3 (lane-padded)
            resident((1, A_pad)),    # b3 (lane-padded)
        ],
        out_specs=pl.BlockSpec((bt, A_pad), lambda i: (i, 0)),
        compiler_params=pltpu.CompilerParams(
            # Batch tiles are independent -> shard across v7x's 2 TensorCores.
            dimension_semantics=("parallel",),
        ),
    )(states, inv_std, shift, w1c, b1, w2c, b2, w3c, b3)

    return out[:B, :A]


def init_params(key, state_dim, action_dim, hidden=(64, 64)):
    """Deterministic synthetic init (PyTorch-Linear-style uniform bounds)."""
    dims = (state_dim,) + tuple(hidden) + (action_dim,)
    keys = jax.random.split(key, 2 * (len(dims) - 1))
    params = {}
    for i in range(len(dims) - 1):
        fan_in, fan_out = dims[i], dims[i + 1]
        bound = 1.0 / jnp.sqrt(fan_in)
        # stored as (in, out) so the kernel computes x @ W + b
        params[f"w{i+1}"] = jax.random.uniform(
            keys[2 * i], (fan_in, fan_out), jnp.float32, -bound, bound)
        params[f"b{i+1}"] = jax.random.uniform(
            keys[2 * i + 1], (1, fan_out), jnp.float32, -bound, bound)
    # buffers from the module: mean = zeros(state_shape), std = ones(state_shape)
    params["mean"] = jnp.zeros((1, state_dim), jnp.float32)
    params["std"] = jnp.ones((1, state_dim), jnp.float32)
    # log_stds exists in the module but is unused by forward()
    params["log_stds"] = jnp.zeros((1, action_dim), jnp.float32)
    return params


def reference_forward(states, params, *, mxu_dtype=jnp.float32):
    """Pure-JAX reference. mxu_dtype=bfloat16 matches the kernel's MXU rounding."""
    xn = jnp.clip((states - params["mean"]) / params["std"], -5.0, 5.0)
    w1 = params["w1"].astype(mxu_dtype)
    w2 = params["w2"].astype(mxu_dtype)
    w3 = params["w3"].astype(mxu_dtype)
    h1 = jnp.tanh(jnp.dot(xn.astype(mxu_dtype), w1,
                          preferred_element_type=jnp.float32) + params["b1"])
    h2 = jnp.tanh(jnp.dot(h1.astype(mxu_dtype), w2,
                          preferred_element_type=jnp.float32) + params["b2"])
    return jnp.tanh(jnp.dot(h2.astype(mxu_dtype), w3,
                            preferred_element_type=jnp.float32) + params["b3"])


if __name__ == "__main__":
    key = jax.random.PRNGKey(0)
    k_param, k_state = jax.random.split(key)

    batch, state_dim, action_dim = 2, 16, 4
    params = init_params(k_param, state_dim, action_dim, hidden=(64, 64))
    states = jax.random.normal(k_state, (batch, state_dim), jnp.float32) * 3.0

    # Production (bf16-MXU) path.
    out = state_independent_policy_forward(states, params)
    out = jax.block_until_ready(out)
    assert out.shape == (batch, action_dim)

    # Strict check vs a reference using the same bf16 MXU operand rounding.
    ref_matched = reference_forward(states, params, mxu_dtype=jnp.bfloat16)
    assert jnp.allclose(out, ref_matched, atol=1e-3, rtol=1e-3), \
        "mismatch vs matched-precision reference"

    # Loose sanity check vs the pure-f32 reference (bf16 MXU rounding only).
    ref_f32 = reference_forward(states, params, mxu_dtype=jnp.float32)
    assert jnp.allclose(out, ref_f32, atol=5e-2, rtol=5e-2), \
        "mismatch vs f32 reference"

    # Full-f32 kernel path must match the f32 reference tightly.
    out_f32 = state_independent_policy_forward(states, params,
                                               use_bf16_matmul=False)
    out_f32 = jax.block_until_ready(out_f32)
    assert jnp.allclose(out_f32, ref_f32, atol=1e-5, rtol=1e-5), \
        "f32 kernel path mismatch vs f32 reference"

    # TODO(synk): sample() / evaluate_log_pi() (Gaussian reparameterization and
    # log-prob on top of the same MLP) are not implemented; only forward().

    print("KERNEL_OK")
</pallas_src>

<mosaic_0001>
module attributes {stable_mosaic.version = 11 : i64} {
  func.func @_policy_kernel(%arg0: i32, %arg1: memref<8x16xf32, #tpu.memory_space<vmem>>, %arg2: memref<1x16xf32, #tpu.memory_space<vmem>>, %arg3: memref<1x16xf32, #tpu.memory_space<vmem>>, %arg4: memref<16x64xbf16, #tpu.memory_space<vmem>>, %arg5: memref<1x64xf32, #tpu.memory_space<vmem>>, %arg6: memref<64x64xbf16, #tpu.memory_space<vmem>>, %arg7: memref<1x64xf32, #tpu.memory_space<vmem>>, %arg8: memref<64x128xbf16, #tpu.memory_space<vmem>>, %arg9: memref<1x128xf32, #tpu.memory_space<vmem>>, %arg10: memref<8x128xf32, #tpu.memory_space<vmem>>) attributes {dimension_semantics = [#tpu.dimension_semantics<parallel>], iteration_bounds = array<i64: 1>, scalar_prefetch = 0 : i64, scratch_operands = 0 : i64, tpu.core_type = #tpu.core_type<tc>, window_params = [{transform_indices = @transform_0, window_bounds = array<i64: 8, 16>}, {pipeline_mode = #tpu.pipeline_mode<synchronous>, transform_indices = @transform_1, window_bounds = array<i64: 1, 16>}, {pipeline_mode = #tpu.pipeline_mode<synchronous>, transform_indices = @transform_2, window_bounds = array<i64: 1, 16>}, {pipeline_mode = #tpu.pipeline_mode<synchronous>, transform_indices = @transform_3, window_bounds = array<i64: 16, 64>}, {pipeline_mode = #tpu.pipeline_mode<synchronous>, transform_indices = @transform_4, window_bounds = array<i64: 1, 64>}, {pipeline_mode = #tpu.pipeline_mode<synchronous>, transform_indices = @transform_5, window_bounds = array<i64: 64, 64>}, {pipeline_mode = #tpu.pipeline_mode<synchronous>, transform_indices = @transform_6, window_bounds = array<i64: 1, 64>}, {pipeline_mode = #tpu.pipeline_mode<synchronous>, transform_indices = @transform_7, window_bounds = array<i64: 64, 128>}, {pipeline_mode = #tpu.pipeline_mode<synchronous>, transform_indices = @transform_8, window_bounds = array<i64: 1, 128>}, {transform_indices = @transform_9, window_bounds = array<i64: 8, 128>}]} {
    %c0 = arith.constant 0 : index
    %c0_0 = arith.constant 0 : index
    %0 = vector.load %arg1[%c0, %c0_0] : memref<8x16xf32, #tpu.memory_space<vmem>>, vector<8x16xf32>
    %c0_1 = arith.constant 0 : index
    %c0_2 = arith.constant 0 : index
    %1 = vector.load %arg2[%c0_1, %c0_2] : memref<1x16xf32, #tpu.memory_space<vmem>>, vector<1x16xf32>
    %2 = vector.broadcast %1 : vector<1x16xf32> to vector<8x16xf32>
    %3 = arith.mulf %0, %2 : vector<8x16xf32>
    %c0_3 = arith.constant 0 : index
    %c0_4 = arith.constant 0 : index
    %4 = vector.load %arg3[%c0_3, %c0_4] : memref<1x16xf32, #tpu.memory_space<vmem>>, vector<1x16xf32>
    %5 = vector.broadcast %4 : vector<1x16xf32> to vector<8x16xf32>
    %6 = arith.addf %3, %5 : vector<8x16xf32>
    %cst = arith.constant -5.000000e+00 : f32
    %cst_5 = arith.constant 5.000000e+00 : f32
    %7 = vector.broadcast %cst : f32 to vector<8x16xf32>
    %8 = arith.maximumf %7, %6 : vector<8x16xf32>
    %9 = vector.broadcast %cst_5 : f32 to vector<8x16xf32>
    %10 = arith.minimumf %9, %8 : vector<8x16xf32>
    %11 = arith.truncf %10 : vector<8x16xf32> to vector<8x16xbf16>
    %c0_6 = arith.constant 0 : index
    %c0_7 = arith.constant 0 : index
    %12 = vector.load %arg4[%c0_6, %c0_7] : memref<16x64xbf16, #tpu.memory_space<vmem>>, vector<16x64xbf16>
    %cst_8 = arith.constant dense<0.000000e+00> : vector<8x64xf32>
    %13 = tpu.matmul %11, %12, %cst_8 {dimension_numbers = #tpu.dot_dimension_numbers<[1], [0], [0], [1], [0, 0, 1, 1], [], []>} : vector<8x16xbf16>, vector<16x64xbf16>, vector<8x64xf32> -> vector<8x64xf32>
    %c0_9 = arith.constant 0 : index
    %c0_10 = arith.constant 0 : index
    %14 = vector.load %arg5[%c0_9, %c0_10] : memref<1x64xf32, #tpu.memory_space<vmem>>, vector<1x64xf32>
    %15 = vector.broadcast %14 : vector<1x64xf32> to vector<8x64xf32>
    %16 = arith.addf %13, %15 : vector<8x64xf32>
    %17 = math.tanh %16 : vector<8x64xf32>
    %18 = arith.truncf %17 : vector<8x64xf32> to vector<8x64xbf16>
    %c0_11 = arith.constant 0 : index
    %c0_12 = arith.constant 0 : index
    %19 = vector.load %arg6[%c0_11, %c0_12] : memref<64x64xbf16, #tpu.memory_space<vmem>>, vector<64x64xbf16>
    %cst_13 = arith.constant dense<0.000000e+00> : vector<8x64xf32>
    %20 = tpu.matmul %18, %19, %cst_13 {dimension_numbers = #tpu.dot_dimension_numbers<[1], [0], [0], [1], [0, 0, 1, 1], [], []>} : vector<8x64xbf16>, vector<64x64xbf16>, vector<8x64xf32> -> vector<8x64xf32>
    %c0_14 = arith.constant 0 : index
    %c0_15 = arith.constant 0 : index
    %21 = vector.load %arg7[%c0_14, %c0_15] : memref<1x64xf32, #tpu.memory_space<vmem>>, vector<1x64xf32>
    %22 = vector.broadcast %21 : vector<1x64xf32> to vector<8x64xf32>
    %23 = arith.addf %20, %22 : vector<8x64xf32>
    %24 = math.tanh %23 : vector<8x64xf32>
    %25 = arith.truncf %24 : vector<8x64xf32> to vector<8x64xbf16>
    %c0_16 = arith.constant 0 : index
    %c0_17 = arith.constant 0 : index
    %26 = vector.load %arg8[%c0_16, %c0_17] : memref<64x128xbf16, #tpu.memory_space<vmem>>, vector<64x128xbf16>
    %cst_18 = arith.constant dense<0.000000e+00> : vector<8x128xf32>
    %27 = tpu.matmul %25, %26, %cst_18 {dimension_numbers = #tpu.dot_dimension_numbers<[1], [0], [0], [1], [0, 0, 1, 1], [], []>} : vector<8x64xbf16>, vector<64x128xbf16>, vector<8x128xf32> -> vector<8x128xf32>
    %c0_19 = arith.constant 0 : index
    %c0_20 = arith.constant 0 : index
    %28 = vector.load %arg9[%c0_19, %c0_20] : memref<1x128xf32, #tpu.memory_space<vmem>>, vector<1x128xf32>
    %29 = vector.broadcast %28 : vector<1x128xf32> to vector<8x128xf32>
    %30 = arith.addf %27, %29 : vector<8x128xf32>
    %31 = math.tanh %30 : vector<8x128xf32>
    %c0_21 = arith.constant 0 : index
    %c0_22 = arith.constant 0 : index
    %32 = vector.load %arg10[%c0_21, %c0_22] : memref<8x128xf32, #tpu.memory_space<vmem>>, vector<8x128xf32>
    tpu.vector_store %arg10[%c0_21, %c0_22], %31 {strides = array<i32>} : memref<8x128xf32, #tpu.memory_space<vmem>>, vector<8x128xf32>,
    return
  }
  func.func @transform_0(%arg0: i32) -> (i32, i32) {
    %c0_i32 = arith.constant 0 : i32
    %c0_i32_0 = arith.constant 0 : i32
    return %arg0, %c0_i32 : i32, i32
  }
  func.func @transform_1(%arg0: i32) -> (i32, i32) {
    %c0_i32 = arith.constant 0 : i32
    %c0_i32_0 = arith.constant 0 : i32
    %c0_i32_1 = arith.constant 0 : i32
    return %c0_i32, %c0_i32_0 : i32, i32
  }
  func.func @transform_2(%arg0: i32) -> (i32, i32) {
    %c0_i32 = arith.constant 0 : i32
    %c0_i32_0 = arith.constant 0 : i32
    %c0_i32_1 = arith.constant 0 : i32
    return %c0_i32, %c0_i32_0 : i32, i32
  }
  func.func @transform_3(%arg0: i32) -> (i32, i32) {
    %c0_i32 = arith.constant 0 : i32
    %c0_i32_0 = arith.constant 0 : i32
    %c0_i32_1 = arith.constant 0 : i32
    return %c0_i32, %c0_i32_0 : i32, i32
  }
  func.func @transform_4(%arg0: i32) -> (i32, i32) {
    %c0_i32 = arith.constant 0 : i32
    %c0_i32_0 = arith.constant 0 : i32
    %c0_i32_1 = arith.constant 0 : i32
    return %c0_i32, %c0_i32_0 : i32, i32
  }
  func.func @transform_5(%arg0: i32) -> (i32, i32) {
    %c0_i32 = arith.constant 0 : i32
    %c0_i32_0 = arith.constant 0 : i32
    %c0_i32_1 = arith.constant 0 : i32
    return %c0_i32, %c0_i32_0 : i32, i32
  }
  func.func @transform_6(%arg0: i32) -> (i32, i32) {
    %c0_i32 = arith.constant 0 : i32
    %c0_i32_0 = arith.constant 0 : i32
    %c0_i32_1 = arith.constant 0 : i32
    return %c0_i32, %c0_i32_0 : i32, i32
  }
  func.func @transform_7(%arg0: i32) -> (i32, i32) {
    %c0_i32 = arith.constant 0 : i32
    %c0_i32_0 = arith.constant 0 : i32
    %c0_i32_1 = arith.constant 0 : i32
    return %c0_i32, %c0_i32_0 : i32, i32
  }
  func.func @transform_8(%arg0: i32) -> (i32, i32) {
    %c0_i32 = arith.constant 0 : i32
    %c0_i32_0 = arith.constant 0 : i32
    %c0_i32_1 = arith.constant 0 : i32
    return %c0_i32, %c0_i32_0 : i32, i32
  }
  func.func @transform_9(%arg0: i32) -> (i32, i32) {
    %c0_i32 = arith.constant 0 : i32
    %c0_i32_0 = arith.constant 0 : i32
    return %arg0, %c0_i32 : i32, i32
  }
}

</mosaic_0001>

<bundles_post_ra>
// kernel: tpu_custom_call.1
= control target key start
LH: loop header
LB: loop body
LE: loop exit
PB: predicated region body
PF: predicated region fallthrough
CT: control target
= control target key end

     0   :  { %14 = vsyncpa [#allocation3], 0  ;;  %s651_s0 = inlined_call_operand.hbm [shape: f32[8,16], index: 0, kind: input, shape index: {}]   ;;  %s652_s1 = inlined_call_operand.vmem [shape: f32[1,16], index: 1, kind: input, shape index: {}]   ;;  %s653_s2 = inlined_call_operand.vmem [shape: f32[1,16], index: 2, kind: input, shape index: {}]   ;;  %s654_s3 = inlined_call_operand.vmem [shape: bf16[16,64], index: 3, kind: input, shape index: {}]   ;;  %s655_s4 = inlined_call_operand.vmem [shape: f32[1,64], index: 4, kind: input, shape index: {}]   ;;  %s656_s5 = inlined_call_operand.hbm [shape: bf16[64,64], index: 5, kind: input, shape index: {}]   ;;  %s657_s6 = inlined_call_operand.vmem [shape: f32[1,64], index: 6, kind: input, shape index: {}]   ;;  %s658_s7 = inlined_call_operand.hbm [shape: bf16[64,128], index: 7, kind: input, shape index: {}]   ;;  %s659_s8 = inlined_call_operand.vmem [shape: f32[1,128], index: 8, kind: input, shape index: {}]   ;;  %s660_s9 = inlined_call_operand.hbm [shape: f32[8,128], index: 9, kind: output, shape index: {}]  }
   0x1   :  { %15 = vsyncpa [#allocation6], 0 }
   0x2   :  { %16 = vsyncpa [#allocation4], 0  ;;  %s516_s30 = smov [#allocation5]   ;;  %s422_s13 = scalar_lea.hbm %s656_s5, 512 }
   0x3   :  { %s40_s10 = sshll.u32 %s516_s30, 4  ;;  %p423_p0 = scmp.ne.s32.totalorder %s656_s5, %s422_s13  ;;  %s41_s10 = int_to_ptr.vmem [resolvable:$true] %s40_s10 }
   0x4   :  { %p426_p1 = scmp.lt.u32.totalorder %s422_s13, %s656_s5 }
   0x6   :  { %p428_p2 = pnand %p426_p1, %p423_p0 }
   0x8   :  { %431 = shalt.err (!%p428_p2)
}
   0x9   :  { %s432_s18 = scalar_lea.vmem %s41_s10, 512  ;;  %p437_p4 = scmp.lt.s32.totalorder %s41_s10, %s41_s10 }
   0xa   :  { %p433_p3 = scmp.ne.s32.totalorder %s41_s10, %s432_s18  ;;  %p438_p5 = scmp.lt.s32.totalorder %s432_s18, %s432_s18 }
   0xc   :  { %p439_p6 = por %p438_p5, %p437_p4 }
   0xe   :  { %p440_p7 = pnand %p439_p6, %p433_p3 }
  0x10   :  { %443 = shalt.err (!%p440_p7)
}
  0x11   :  { %s517_s19 = smov 64   ;;  %s518_s20 = smov 4  }
  0x12   :  { %46 = dma.hbm_to_vmem [thread:$0]  %s656_s5, 512, %s41_s10, [#allocation6], %s517_s19, %s517_s19, %s518_s20  }
  0x13   :  { %s519_s23 = smov [#allocation2]   ;;  %s520_s25 = smov [#allocation7]  }
  0x14   :  { %s23_s24 = sshll.u32 %s519_s23, 4  ;;  %s54_s26 = sshll.u32 %s520_s25, 4  ;;  %s24_s24 = int_to_ptr.vmem [resolvable:$true] %s23_s24  ;;  %s55_s26 = int_to_ptr.vmem [resolvable:$true] %s54_s26 }
  0x15   :  { %s444_s29 = scalar_lea.hbm %s651_s0, 128 }
  0x16   :  { %p445_p8 = scmp.ne.s32.totalorder %s651_s0, %s444_s29  ;;  %p448_p9 = scmp.lt.u32.totalorder %s444_s29, %s651_s0 }
  0x18   :  { %p450_p10 = pnand %p448_p9, %p445_p8 }
  0x1a   :  { %453 = shalt.err (!%p450_p10)
}
  0x1b   :  { %s454_s5 = scalar_lea.vmem %s24_s24, 128  ;;  %p459_p12 = scmp.lt.s32.totalorder %s24_s24, %s24_s24 }
  0x1c   :  { %p455_p11 = scmp.ne.s32.totalorder %s24_s24, %s454_s5  ;;  %p460_p13 = scmp.lt.s32.totalorder %s454_s5, %s454_s5 }
  0x1e   :  { %p461_p0 = por %p460_p13, %p459_p12 }
  0x20   :  { %p462_p1 = pnand %p461_p0, %p455_p11 }
  0x22   :  { %465 = shalt.err (!%p462_p1)
}
  0x23   :  { %26 = dma.hbm_to_vmem [thread:$0]  %s651_s0, 128, %s24_s24, [#allocation3]  }
  0x24   :  { %s466_s17 = scalar_lea.hbm %s658_s7, 512 }
  0x25   :  { %p467_p2 = scmp.ne.s32.totalorder %s658_s7, %s466_s17  ;;  %p470_p3 = scmp.lt.u32.totalorder %s466_s17, %s658_s7 }
  0x27   :  { %p472_p4 = pnand %p470_p3, %p467_p2 }
  0x29   :  { %475 = shalt.err (!%p472_p4)
}
  0x2a   :  { %s476_s25 = scalar_lea.vmem %s55_s26, 512  ;;  %p481_p6 = scmp.lt.s32.totalorder %s55_s26, %s55_s26 }
  0x2b   :  { %p477_p5 = scmp.ne.s32.totalorder %s55_s26, %s476_s25  ;;  %p482_p7 = scmp.lt.s32.totalorder %s476_s25, %s476_s25 }
  0x2d   :  { %p483_p8 = por %p482_p7, %p481_p6 }
  0x2f   :  { %p484_p9 = pnand %p483_p8, %p477_p5 }
  0x31   :  { %487 = shalt.err (!%p484_p9)
}
  0x32   :  { %60 = dma.hbm_to_vmem [thread:$0]  %s658_s7, 512, %s55_s26, [#allocation6], %s517_s19, %s517_s19, %s518_s20  }
  0x33   :  { %510 = dma.done.wait [#allocation3], 128  }
  0x34   :  { %511 = vsyncadd [#allocation3], 4294967168 }
  0x35   :  { %512 = dma.done.wait [#allocation6], 1024  }
  0x36   :  { %513 = vsyncadd [#allocation6], 4294966272  ;;  %v521_v0 = vmov 0.0   ;;  %vm522_vm0 = vmmov 0   ;;  %v407_v1 = vld [vmem:[%s654_s3] sm:$0xff]   ;;  %vm108_vm1 = vcmask 130048  }
  0x37   :  { %369 = vmatprep.subr.bf16.mxu0 %v521_v0  ;;  %371 = vmatprep.mubr.msk.bf16.mxu0 %vm522_vm0, %v521_v0  ;;  %v73_v2 = vld [vmem:[#allocation2] sm:$0xff]  ;;  %v408_v9 = vld [vmem:[#allocation5] sm:$0xff]   ;;  %v409_v10 = vld [vmem:[#allocation5 + $0x8] sm:$0xff]   ;;  %vm193_vm2 = vcmask 523264  }
  0x38   :  { %375 = vmatprep.subr.bf16.mxu1 %v521_v0  ;;  %383 = vmatprep.mubr.msk.bf16.mxu1 %vm522_vm0, %v521_v0  ;;  %v339_v3 = vld [vmem:[%s652_s1] ss:$0 sm:$0xff]  ;;  %v410_v11 = vld [vmem:[#allocation5 + $0x10] sm:$0xff]   ;;  %v412_v21 = vld [vmem:[#allocation7] sm:$0xff]  }
  0x39   :  { %v340_v4 = vld [vmem:[%s653_s2] ss:$0 sm:$0xff]  ;;  %370 = vmatpush3.bf16.msra.mxu0 %v407_v1  ;;  %v81_v5 = vmul.f32 %v339_v3, %v73_v2  ;;  %376 = vmatpush3.bf16.msra.mxu1 %v408_v9  ;;  %v413_v22 = vld [vmem:[#allocation7 + $0x8] sm:$0xff]   ;;  %v414_v23 = vld [vmem:[#allocation7 + $0x10] sm:$0xff]  }
  0x3a   :  { %387 = vmatprep.subr.bf16.mxu0 %v521_v0  ;;  %377 = vmatprep.subr.bf16.mxu1 %v521_v0  ;;  %v411_v12 = vld [vmem:[#allocation5 + $0x18] sm:$0xff]  }
  0x3b   :  { %v89_v6 = vadd.f32 %v340_v4, %v81_v5  ;;  %v342_v13 = vld [vmem:[%s655_s4] ss:$0 sm:$0xff] }
  0x3c   :  { %v415_v24 = vld [vmem:[#allocation7 + $0x18] sm:$0xff]  }
  0x3d   :  { %v341_v7 = vclamps-f32 %v89_v6, 5.0  ;;  %378 = vmatpush3.bf16.msra.mxu1 %v409_v10  ;;  %v345_v25 = vld [vmem:[%s657_s6] ss:$0 sm:$0xff]  ;;  %s523_s6 = smov [#allocation8]  }
  0x3e   :  { %379 = vmatprep.subr.bf16.mxu1 %v521_v0  ;;  %v351_v33 = vld [vmem:[%s659_s8] ss:$0 sm:$0xff]  ;;  %s329_s11 = sshll.u32 %s523_s6, 4  ;;  %s330_s11 = int_to_ptr.vmem [resolvable:$true] %s329_s11 }
  0x3f   :  { %v92_v8 = vpack.c.bf16 %v341_v7, %v341_v7  ;;  %s488_s12 = scalar_lea.vmem %s330_s11, 128  ;;  %p493_p11 = scmp.lt.s32.totalorder %s330_s11, %s330_s11 }
  0x40   :  { %p489_p10 = scmp.ne.s32.totalorder %s330_s11, %s488_s12  ;;  %p494_p12 = scmp.lt.s32.totalorder %s488_s12, %s488_s12 }
  0x41   :  { %372 = vmatmul.mubr.msk.bf16.vlgmr.msra.gmra.mrb[0].mxu0 %vm108_vm1, %v92_v8  ;;  %380 = vmatpush3.bf16.msra.mxu1 %v410_v11 }
  0x42   :  { %395 = vmatprep.mubr.msk.bf16.mxu0 %vm522_vm0, %v521_v0  ;;  %381 = vmatprep.subr.bf16.mxu1 %v521_v0  ;;  %p495_p13 = por %p494_p12, %p493_p11 }
  0x43   :  { %388 = vmatpush3.bf16.msra.mxu0 %v412_v21 }
  0x44   :  { %389 = vmatprep.subr.bf16.mxu0 %v521_v0  ;;  %p496_p0 = pnand %p495_p13, %p489_p10 }
  0x45   :  { %382 = vmatpush3.bf16.msra.mxu1 %v411_v12 }
  0x47   :  { %390 = vmatpush3.bf16.msra.mxu0 %v413_v22 }
  0x48   :  { %391 = vmatprep.subr.bf16.mxu0 %v521_v0 }
  0x4b   :  { %392 = vmatpush3.bf16.msra.mxu0 %v414_v23 }
  0x4c   :  { %393 = vmatprep.subr.bf16.mxu0 %v521_v0 }
  0x4f   :  { %394 = vmatpush3.bf16.msra.mxu0 %v415_v24 }
 0x114   :  { %v146_v14 = vpop.f32.mrb[0].mxu0 }
 0x115   :  { %v147_v15 = vadd.f32 %v342_v13, %v146_v14  ;;  %v373_v16 = vpop.f32.mrb[1].mxu0 }
 0x116   :  { %v149_v17 = vpop.f32.mrb[2].mxu0 }
 0x117   :  { %416 = vtanh.f32 %v147_v15  ;;  %v374_v18 = vpop.f32.mrb[3].mxu0 }
 0x121   :  { %v417_v19 = vpop.eup %416 }
 0x122   :  { %v153_v20 = vpack.c.bf16 %v417_v19, %v417_v19 }
 0x124   :  { %384 = vmatmul.mubr.msk.bf16.vlgmr.msra.gmra.mrb[0].mxu1 %vm193_vm2, %v153_v20 }
 0x1f7   :  { %v231_v26 = vpop.f32.mrb[0].mxu1 }
 0x1f8   :  { %v232_v27 = vadd.f32 %v345_v25, %v231_v26  ;;  %v385_v28 = vpop.f32.mrb[1].mxu1 }
 0x1f9   :  { %v234_v29 = vpop.f32.mrb[2].mxu1 }
 0x1fa   :  { %418 = vtanh.f32 %v232_v27  ;;  %v386_v30 = vpop.f32.mrb[3].mxu1 }
 0x204   :  { %v419_v31 = vpop.eup %418 }
 0x205   :  { %v238_v32 = vpack.c.bf16 %v419_v31, %v419_v31 }
 0x207   :  { %396 = vmatmul.mubr.msk.bf16.vlgmr.msra.gmra.mrb[4].mxu0 %vm193_vm2, %v238_v32 }
 0x2da   :  { %v315_v34 = vpop.f32.mrb[4].mxu0 }
 0x2db   :  { %v316_v35 = vadd.f32 %v351_v33, %v315_v34  ;;  %v397_v36 = vpop.f32.mrb[5].mxu0 }
 0x2dc   :  { %v318_v37 = vpop.f32.mrb[6].mxu0 }
 0x2dd   :  { %420 = vtanh.f32 %v316_v35  ;;  %v398_v38 = vpop.f32.mrb[7].mxu0 }
 0x2e7   :  { %v421_v39 = vpop.eup %420 }
 0x2e8   :  { %322 = vst [vmem:[#allocation8] sm:$0xff] %v421_v39 }
 0x2e9   :  { %499 = shalt.err (!%p496_p0)
}
 0x2ea   :  { %s500_s5 = scalar_lea.hbm %s660_s9, 128 }
 0x2eb   :  { %p501_p1 = scmp.ne.s32.totalorder %s660_s9, %s500_s5  ;;  %p504_p2 = scmp.lt.u32.totalorder %s500_s5, %s660_s9 }
 0x2ed   :  { %p506_p3 = pnand %p504_p2, %p501_p1 }
 0x2ef   :  { %509 = shalt.err (!%p506_p3)
}
 0x2f0   :  { %332 = dma.vmem_to_hbm [thread:$0]  %s330_s11, 128, %s660_s9, [#allocation4]  }
 0x2f1   :  { %514 = dma.done.wait [#allocation4], 128  }
 0x2f2   :  { %515 = vsyncadd [#allocation4], 4294967168 }
 0x2f3   :  { %336 = vsyncpa [#allocation3], 1 }
 0x2f4   :  { %337 = vsyncpa [#allocation6], 1 }
 0x2f5   :  { %338 = vsyncpa [#allocation4], 1 }

</bundles_post_ra>
